<compile_context>
chip_gen: v7x
topology: tpu7x:2x2x1
jax: 0.10.0
libtpu: 0.0.40
codegen_flags: <defaults>
</compile_context>

<pallas_src>
import math

import jax
import jax.numpy as jnp
from jax.experimental import pallas as pl
from jax.experimental.pallas import tpu as pltpu

EPS = 1e-6

# Tile footprint budget (input+output DMA double buffers + f32 compute temps).
# Conservative so it fits v7x's 64 MiB physical VMEM with headroom and is far
# under v5e/v6e's 128 MiB.
_TILE_BUDGET_BYTES = 36 * 1024 * 1024
_VMEM_LIMIT_BYTES = 64 * 1024 * 1024


def _layernorm_kernel(x_ref, a_ref, b_ref, o_ref):
    # x_ref: (row_tile, F) ; a_ref, b_ref: (1, F)
    x = x_ref[...].astype(jnp.float32)
    f = x.shape[-1]

    # One-pass statistics: the two reductions are independent (no serial
    # mean -> diff -> reduce chain) and `diff` never needs to live across a
    # second reduction.
    s = jnp.sum(x, axis=-1, keepdims=True)
    sq = jnp.sum(x * x, axis=-1, keepdims=True)
    mean = s * (1.0 / f)
    # PyTorch x.std(-1) is the unbiased (ddof=1) standard deviation.
    var = (sq - s * mean) * (1.0 / (f - 1))
    var = jnp.maximum(var, 0.0)  # guard tiny negative from cancellation
    std = jnp.sqrt(var)

    # Reciprocal + multiply instead of divide; fold a_2 into the scale.
    # approx=False keeps exact semantics (approx=True would trade ~1e-3 error
    # for an EUP-slot reciprocal).
    inv = pl.reciprocal(std + EPS, approx=False)
    a = a_ref[...].astype(jnp.float32)
    b = b_ref[...].astype(jnp.float32)
    o_ref[...] = ((x - mean) * (a * inv) + b).astype(o_ref.dtype)


def _pick_row_tile(rows, f, itemsize, budget_bytes=_TILE_BUDGET_BYTES):
    """Largest row tile (multiple of 8) whose estimated VMEM footprint fits."""
    rows_cap = max(8, ((rows + 7) // 8) * 8)
    for tile in (1024, 512, 256, 128, 64, 32, 16, 8):
        dma_bytes = 4 * tile * f * itemsize      # in + out, double-buffered
        temp_bytes = 3 * tile * f * 4            # f32 compute intermediates
        if dma_bytes + temp_bytes <= budget_bytes:
            return max(8, min(tile, rows_cap))
    # TODO(synk): for very large F (>=16K f32) split the feature axis onto a
    # second "arbitrary" grid axis with partial-sum scratch instead of
    # shrinking the row tile this far.
    return 8


def layer_norm(x, a_2, b_2, *, row_tile=None, vmem_limit_bytes=_VMEM_LIMIT_BYTES):
    """x: (..., F); a_2, b_2: (F,). Returns same shape/dtype as x."""
    orig_shape = x.shape
    f = orig_shape[-1]
    rows = math.prod(orig_shape[:-1]) if len(orig_shape) > 1 else 1

    itemsize = jnp.dtype(x.dtype).itemsize
    if row_tile is None:
        row_tile = _pick_row_tile(rows, f, itemsize)

    x2 = x.reshape(rows, f)
    a2 = a_2.reshape(1, f)
    b2 = b_2.reshape(1, f)

    # Pad the row axis to a multiple of row_tile (tail rows are sliced off
    # afterwards), so the performance-optimal tile is always usable.
    padded_rows = pl.cdiv(rows, row_tile) * row_tile
    if padded_rows != rows:
        x2 = jnp.pad(x2, ((0, padded_rows - rows), (0, 0)))

    # TODO(synk): for F < 128 the output stores are masked (vst.msk); a
    # lane-dense path would fold rows into the lane dim or pad+mask F.
    out = pl.pallas_call(
        _layernorm_kernel,
        out_shape=jax.ShapeDtypeStruct((padded_rows, f), x.dtype),
        grid_spec=pltpu.PrefetchScalarGridSpec(
            num_scalar_prefetch=0,
            grid=(padded_rows // row_tile,),
            in_specs=[
                pl.BlockSpec((row_tile, f), lambda i: (i, 0)),
                pl.BlockSpec((1, f), lambda i: (0, 0)),
                pl.BlockSpec((1, f), lambda i: (0, 0)),
            ],
            out_specs=pl.BlockSpec((row_tile, f), lambda i: (i, 0)),
        ),
        compiler_params=pltpu.CompilerParams(
            dimension_semantics=("parallel",),
            vmem_limit_bytes=vmem_limit_bytes,
        ),
    )(x2, a2, b2)

    if padded_rows != rows:
        out = out[:rows]
    return out.reshape(orig_shape)


def _reference(x, a_2, b_2):
    # Matches the PyTorch module: unbiased std, eps added to std (NOT nn.LayerNorm).
    x32 = x.astype(jnp.float32)
    mean = jnp.mean(x32, axis=-1, keepdims=True)
    diff = x32 - mean
    var = jnp.sum(diff * diff, axis=-1, keepdims=True) / (x.shape[-1] - 1)
    std = jnp.sqrt(var)
    return (a_2 * diff / (std + EPS) + b_2).astype(x.dtype)


if __name__ == "__main__":
    key = jax.random.PRNGKey(0)
    batch, seq, hidden = 2, 8, 32

    x = jax.random.normal(key, (batch, seq, hidden), dtype=jnp.float32)

    # Deterministic parameter init matching nn.Parameter(torch.ones/zeros(features)).
    a_2 = jnp.ones((hidden,), dtype=jnp.float32)
    b_2 = jnp.zeros((hidden,), dtype=jnp.float32)

    y = layer_norm(x, a_2, b_2)
    jax.block_until_ready(y)

    y_ref = _reference(x, a_2, b_2)
    assert y.shape == x.shape and y.dtype == x.dtype
    assert jnp.allclose(y, y_ref, atol=1e-5, rtol=1e-5), "mismatch vs reference"

    print("KERNEL_OK")
</pallas_src>

<mosaic_0001>
module attributes {stable_mosaic.version = 11 : i64} {
  func.func @_layernorm_kernel(%arg0: i32, %arg1: memref<16x32xf32, #tpu.memory_space<vmem>>, %arg2: memref<1x32xf32, #tpu.memory_space<vmem>>, %arg3: memref<1x32xf32, #tpu.memory_space<vmem>>, %arg4: memref<16x32xf32, #tpu.memory_space<vmem>>) attributes {dimension_semantics = [#tpu.dimension_semantics<parallel>], iteration_bounds = array<i64: 1>, scalar_prefetch = 0 : i64, scratch_operands = 0 : i64, tpu.core_type = #tpu.core_type<tc>, window_params = [{transform_indices = @transform_0, window_bounds = array<i64: 16, 32>}, {pipeline_mode = #tpu.pipeline_mode<synchronous>, transform_indices = @transform_1, window_bounds = array<i64: 1, 32>}, {pipeline_mode = #tpu.pipeline_mode<synchronous>, transform_indices = @transform_2, window_bounds = array<i64: 1, 32>}, {transform_indices = @transform_3, window_bounds = array<i64: 16, 32>}]} {
    %c0 = arith.constant 0 : index
    %c0_0 = arith.constant 0 : index
    %0 = vector.load %arg1[%c0, %c0_0] : memref<16x32xf32, #tpu.memory_space<vmem>>, vector<16x32xf32>
    %cst = arith.constant dense<0.000000e+00> : vector<16xf32>
    %1 = vector.multi_reduction <add>, %0, %cst [1] : vector<16x32xf32> to vector<16xf32>
    %2 = vector.shape_cast %1 : vector<16xf32> to vector<16x1xf32>
    %3 = arith.mulf %0, %0 : vector<16x32xf32>
    %cst_1 = arith.constant dense<0.000000e+00> : vector<16xf32>
    %4 = vector.multi_reduction <add>, %3, %cst_1 [1] : vector<16x32xf32> to vector<16xf32>
    %5 = vector.shape_cast %4 : vector<16xf32> to vector<16x1xf32>
    %cst_2 = arith.constant 3.125000e-02 : f32
    %6 = vector.broadcast %cst_2 : f32 to vector<16x1xf32>
    %7 = arith.mulf %2, %6 : vector<16x1xf32>
    %8 = arith.mulf %2, %7 : vector<16x1xf32>
    %9 = arith.subf %5, %8 : vector<16x1xf32>
    %cst_3 = arith.constant 0.0322580636 : f32
    %10 = vector.broadcast %cst_3 : f32 to vector<16x1xf32>
    %11 = arith.mulf %9, %10 : vector<16x1xf32>
    %cst_4 = arith.constant 0.000000e+00 : f32
    %12 = vector.broadcast %cst_4 : f32 to vector<16x1xf32>
    %13 = arith.maximumf %11, %12 : vector<16x1xf32>
    %14 = math.sqrt %13 : vector<16x1xf32>
    %cst_5 = arith.constant 9.99999997E-7 : f32
    %15 = vector.broadcast %cst_5 : f32 to vector<16x1xf32>
    %16 = arith.addf %14, %15 : vector<16x1xf32>
    %17 = tpu.reciprocal %16 : vector<16x1xf32> -> vector<16x1xf32>
    %c0_6 = arith.constant 0 : index
    %c0_7 = arith.constant 0 : index
    %18 = vector.load %arg2[%c0_6, %c0_7] : memref<1x32xf32, #tpu.memory_space<vmem>>, vector<1x32xf32>
    %c0_8 = arith.constant 0 : index
    %c0_9 = arith.constant 0 : index
    %19 = vector.load %arg3[%c0_8, %c0_9] : memref<1x32xf32, #tpu.memory_space<vmem>>, vector<1x32xf32>
    %20 = vector.broadcast %7 : vector<16x1xf32> to vector<16x32xf32>
    %21 = arith.subf %0, %20 : vector<16x32xf32>
    %22 = vector.broadcast %18 : vector<1x32xf32> to vector<16x32xf32>
    %23 = vector.broadcast %17 : vector<16x1xf32> to vector<16x32xf32>
    %24 = arith.mulf %22, %23 : vector<16x32xf32>
    %25 = arith.mulf %21, %24 : vector<16x32xf32>
    %26 = vector.broadcast %19 : vector<1x32xf32> to vector<16x32xf32>
    %27 = arith.addf %25, %26 : vector<16x32xf32>
    %c0_10 = arith.constant 0 : index
    %c0_11 = arith.constant 0 : index
    %28 = vector.load %arg4[%c0_10, %c0_11] : memref<16x32xf32, #tpu.memory_space<vmem>>, vector<16x32xf32>
    tpu.vector_store %arg4[%c0_10, %c0_11], %27 {strides = array<i32>} : memref<16x32xf32, #tpu.memory_space<vmem>>, vector<16x32xf32>,
    return
  }
  func.func @transform_0(%arg0: i32) -> (i32, i32) {
    %c0_i32 = arith.constant 0 : i32
    %c0_i32_0 = arith.constant 0 : i32
    return %arg0, %c0_i32 : i32, i32
  }
  func.func @transform_1(%arg0: i32) -> (i32, i32) {
    %c0_i32 = arith.constant 0 : i32
    %c0_i32_0 = arith.constant 0 : i32
    %c0_i32_1 = arith.constant 0 : i32
    return %c0_i32, %c0_i32_0 : i32, i32
  }
  func.func @transform_2(%arg0: i32) -> (i32, i32) {
    %c0_i32 = arith.constant 0 : i32
    %c0_i32_0 = arith.constant 0 : i32
    %c0_i32_1 = arith.constant 0 : i32
    return %c0_i32, %c0_i32_0 : i32, i32
  }
  func.func @transform_3(%arg0: i32) -> (i32, i32) {
    %c0_i32 = arith.constant 0 : i32
    %c0_i32_0 = arith.constant 0 : i32
    return %arg0, %c0_i32 : i32, i32
  }
}

</mosaic_0001>

<bundles_post_ra>
// kernel: tpu_custom_call.1
= control target key start
LH: loop header
LB: loop body
LE: loop exit
PB: predicated region body
PF: predicated region fallthrough
CT: control target
= control target key end

     0   :  { %8 = vsyncpa [#allocation3], 0  ;;  %s342_s0 = inlined_call_operand.hbm [shape: f32[16,32], index: 0, kind: input, shape index: {}]   ;;  %s343_s1 = inlined_call_operand.hbm [shape: f32[1,32], index: 1, kind: input, shape index: {}]   ;;  %s344_s2 = inlined_call_operand.hbm [shape: f32[1,32], index: 2, kind: input, shape index: {}]   ;;  %s345_s3 = inlined_call_operand.hbm [shape: f32[16,32], index: 3, kind: output, shape index: {}]  }
   0x1   :  { %9 = vsyncpa [#allocation6], 0 }
   0x2   :  { %10 = vsyncpa [#allocation4], 0  ;;  %s249_s12 = smov [#allocation5]   ;;  %s250_s14 = smov [#allocation2]  }
   0x3   :  { %s29_s13 = sshll.u32 %s249_s12, 4  ;;  %s16_s15 = sshll.u32 %s250_s14, 4  ;;  %s30_s13 = int_to_ptr.vmem [resolvable:$true] %s29_s13  ;;  %s275_s15 = int_to_ptr.vmem [resolvable:$true] %s16_s15 }
   0x4   :  { %s155_s18 = scalar_lea.hbm %s343_s1, 16 }
   0x5   :  { %p156_p0 = scmp.ne.s32.totalorder %s343_s1, %s155_s18  ;;  %p159_p1 = scmp.lt.u32.totalorder %s155_s18, %s343_s1 }
   0x7   :  { %p161_p2 = pnand %p159_p1, %p156_p0 }
   0x9   :  { %164 = shalt.err (!%p161_p2)
}
   0xa   :  { %s165_s23 = scalar_lea.vmem %s30_s13, 16  ;;  %s169_s24 = scalar_lea.vmem %s30_s13, 32 }
   0xb   :  { %p166_p3 = scmp.ne.s32.totalorder %s30_s13, %s165_s23  ;;  %p170_p4 = scmp.lt.s32.totalorder %s30_s13, %s30_s13 }
   0xc   :  { %p171_p5 = scmp.lt.s32.totalorder %s169_s24, %s165_s23 }
   0xe   :  { %p172_p6 = por %p171_p5, %p170_p4 }
  0x10   :  { %p173_p7 = pnand %p172_p6, %p166_p3 }
  0x12   :  { %176 = shalt.err (!%p173_p7)
}
  0x13   :  { %32 = dma.hbm_to_vmem [thread:$0]  %s343_s1, 16, %s30_s13, [#allocation6]  }
  0x14   :  { %s177_s29 = scalar_lea.hbm %s342_s0, 256 }
  0x15   :  { %p178_p8 = scmp.ne.s32.totalorder %s342_s0, %s177_s29  ;;  %p181_p9 = scmp.lt.u32.totalorder %s177_s29, %s342_s0 }
  0x17   :  { %p183_p10 = pnand %p181_p9, %p178_p8 }
  0x19   :  { %186 = shalt.err (!%p183_p10)
}
  0x1a   :  { %s187_s7 = scalar_lea.vmem %s275_s15, 256  ;;  %p192_p12 = scmp.lt.s32.totalorder %s275_s15, %s275_s15 }
  0x1b   :  { %p188_p11 = scmp.ne.s32.totalorder %s275_s15, %s187_s7  ;;  %p193_p13 = scmp.lt.s32.totalorder %s187_s7, %s187_s7 }
  0x1d   :  { %p194_p0 = por %p193_p13, %p192_p12 }
  0x1f   :  { %p195_p1 = pnand %p194_p0, %p188_p11 }
  0x21   :  { %198 = shalt.err (!%p195_p1)
}
  0x22   :  { %s251_s1 = smov 128   ;;  %s252_s8 = smov 8  }
  0x23   :  { %22 = dma.hbm_to_vmem [thread:$0]  %s342_s0, 256, %s275_s15, [#allocation3], %s251_s1, %s251_s1, %s252_s8  }
  0x24   :  { %s253_s11 = smov [#allocation7]   ;;  %s199_s16 = scalar_lea.hbm %s344_s2, 16 }
  0x25   :  { %s39_s12 = sshll.u32 %s253_s11, 4  ;;  %p200_p2 = scmp.ne.s32.totalorder %s344_s2, %s199_s16  ;;  %s40_s12 = int_to_ptr.vmem [resolvable:$true] %s39_s12 }
  0x26   :  { %p203_p3 = scmp.lt.u32.totalorder %s199_s16, %s344_s2 }
  0x28   :  { %p205_p4 = pnand %p203_p3, %p200_p2 }
  0x2a   :  { %208 = shalt.err (!%p205_p4)
}
  0x2b   :  { %s209_s21 = scalar_lea.vmem %s40_s12, 16  ;;  %s213_s0 = scalar_lea.vmem %s40_s12, 32 }
  0x2c   :  { %p210_p5 = scmp.ne.s32.totalorder %s40_s12, %s209_s21  ;;  %p214_p6 = scmp.lt.s32.totalorder %s40_s12, %s40_s12 }
  0x2d   :  { %p215_p7 = scmp.lt.s32.totalorder %s213_s0, %s209_s21 }
  0x2f   :  { %p216_p8 = por %p215_p7, %p214_p6 }
  0x31   :  { %p217_p9 = pnand %p216_p8, %p210_p5 }
  0x33   :  { %220 = shalt.err (!%p217_p9)
}
  0x34   :  { %42 = dma.hbm_to_vmem [thread:$0]  %s344_s2, 16, %s40_s12, [#allocation6]  }
  0x35   :  { %243 = dma.done.wait [#allocation3], 256  }
  0x36   :  { %244 = vsyncadd [#allocation3], 4294967040 }
  0x37   :  { %245 = dma.done.wait [#allocation6], 32  }
  0x38   :  { %246 = vsyncadd [#allocation6], 4294967264  ;;  %vm54_vm0 = vcmask 261120   ;;  %v52_v0 = vld [vmem:[#allocation2] sm:$0xff]  ;;  %v53_v1 = vld [vmem:[#allocation2 + $0x8] sm:$0xff]  ;;  %s254_s2 = smov [#allocation8]  }
  0x39   :  { %v55_v2 = vsel %vm54_vm0, %v52_v0, 0.0  ;;  %v61_v3 = vmul.f32 %v52_v0, %v52_v0  ;;  %v62_v4 = vmul.f32 %v53_v1, %v53_v1  ;;  %v58_v6 = vsel %vm54_vm0, %v53_v1, 0.0  ;;  %v139_v34 = vld [vmem:[#allocation5] ss:$0 sm:$0xff]  ;;  %v140_v38 = vld [vmem:[#allocation7] ss:$0 sm:$0xff] }
  0x3a   :  { %56 = vadd.xlane.f32.xlu0 %v55_v2  ;;  %s126_s23 = sshll.u32 %s254_s2, 4  ;;  %s127_s23 = int_to_ptr.vmem [resolvable:$true] %s126_s23 }
  0x3b   :  { %v63_v5 = vsel %vm54_vm0, %v61_v3, 0.0  ;;  %v66_v7 = vsel %vm54_vm0, %v62_v4, 0.0  ;;  %s221_s24 = scalar_lea.vmem %s127_s23, 256  ;;  %p226_p11 = scmp.lt.s32.totalorder %s127_s23, %s127_s23 }
  0x3c   :  { %64 = vadd.xlane.f32.xlu1 %v63_v5  ;;  %p222_p10 = scmp.ne.s32.totalorder %s127_s23, %s221_s24  ;;  %p227_p12 = scmp.lt.s32.totalorder %s221_s24, %s221_s24 }
  0x3e   :  { %59 = vadd.xlane.f32.xlu0 %v58_v6  ;;  %p228_p13 = por %p227_p12, %p226_p11 }
  0x40   :  { %67 = vadd.xlane.f32.xlu1 %v66_v7  ;;  %p229_p0 = pnand %p228_p13, %p222_p10 }
  0xc7   :  { %v57_v8 = vpop.xlane.xlu0 %56 }
  0xc8   :  { %v69_v9 = vmul.f32 0.03125, %v57_v8 }
  0xc9   :  { %v65_v10 = vpop.xlane.xlu1 %64 }
  0xca   :  { %v71_v11 = vmul.f32 %v69_v9, %v57_v8  ;;  %v99_v36 = vsub.f32 %v52_v0, %v69_v9 }
  0xcb   :  { %v60_v12 = vpop.xlane.xlu0 %59 }
  0xcc   :  { %v73_v13 = vsub.f32 %v65_v10, %v71_v11  ;;  %v70_v14 = vmul.f32 0.03125, %v60_v12 }
  0xcd   :  { %v68_v15 = vpop.xlane.xlu1 %67 }
  0xce   :  { %v75_v16 = vmul.f32 0.032258064, %v73_v13  ;;  %v72_v17 = vmul.f32 %v70_v14, %v60_v12  ;;  %v100_v42 = vsub.f32 %v53_v1, %v70_v14 }
  0xd0   :  { %v77_v18 = vmax.f32 %v75_v16, 0.0  ;;  %v74_v19 = vsub.f32 %v68_v15, %v72_v17 }
  0xd2   :  { %147 = vrsqrt.f32 %v77_v18  ;;  %v76_v20 = vmul.f32 0.032258064, %v74_v19  ;;  %vm81_vm1 = vcmp.eq.f32.partialorder %v77_v18, inf  ;;  %v84_v24 = vand.u32 2147483648, %v77_v18 }
  0xd3   :  { %vm83_vm2 = vcmp.eq.f32.partialorder %v77_v18, 0.0 }
  0xd4   :  { %v78_v21 = vmax.f32 %v76_v20, 0.0 }
  0xd6   :  { %149 = vrsqrt.f32 %v78_v21  ;;  %vm88_vm3 = vcmp.eq.f32.partialorder %v78_v21, inf  ;;  %v91_v30 = vand.u32 2147483648, %v78_v21  ;;  %vm90_vm4 = vcmp.eq.f32.partialorder %v78_v21, 0.0 }
  0xdc   :  { %v148_v22 = vpop.eup %147 }
  0xdd   :  { %v80_v23 = vmul.f32 %v148_v22, %v77_v18 }
  0xdf   :  { %v82_v25 = vsel %vm81_vm1, %v77_v18, %v80_v23 }
  0xe0   :  { %v85_v26 = vsel %vm83_vm2, %v84_v24, %v82_v25  ;;  %v150_v27 = vpop.eup %149 }
  0xe1   :  { %v93_v28 = vadd.f32 1e-06, %v85_v26  ;;  %v87_v29 = vmul.f32 %v150_v27, %v78_v21 }
  0xe3   :  { %151 = vrcp.f32 %v93_v28  ;;  %v89_v31 = vsel %vm88_vm3, %v78_v21, %v87_v29 }
  0xe4   :  { %v92_v32 = vsel %vm90_vm4, %v91_v30, %v89_v31 }
  0xe5   :  { %v94_v33 = vadd.f32 1e-06, %v92_v32 }
  0xe7   :  { %153 = vrcp.f32 %v94_v33 }
  0xed   :  { %v152_v35 = vpop.eup %151 }
  0xee   :  { %v107_v37 = vmul.f32 %v152_v35, %v139_v34 }
  0xf0   :  { %v109_v39 = vmul.f32 %v107_v37, %v99_v36 }
  0xf1   :  { %v154_v40 = vpop.eup %153 }
  0xf2   :  { %v117_v41 = vadd.f32 %v140_v38, %v109_v39  ;;  %v108_v43 = vmul.f32 %v154_v40, %v139_v34 }
  0xf4   :  { %119 = vst.msk [vmem:[#allocation8] sm:$0xff] %vm54_vm0, %v117_v41  ;;  %v110_v44 = vmul.f32 %v108_v43, %v100_v42 }
  0xf6   :  { %v118_v45 = vadd.f32 %v140_v38, %v110_v44 }
  0xf8   :  { %120 = vst.msk [vmem:[#allocation8 + $0x8] sm:$0xff] %vm54_vm0, %v118_v45 }
  0xf9   :  { %232 = shalt.err (!%p229_p0)
}
  0xfa   :  { %s233_s27 = scalar_lea.hbm %s345_s3, 256 }
  0xfb   :  { %p234_p1 = scmp.ne.s32.totalorder %s345_s3, %s233_s27  ;;  %p237_p2 = scmp.lt.u32.totalorder %s233_s27, %s345_s3 }
  0xfd   :  { %p239_p3 = pnand %p237_p2, %p234_p1 }
  0xff   :  { %242 = shalt.err (!%p239_p3)
}
 0x100   :  { %132 = dma.vmem_to_hbm [thread:$0]  %s127_s23, 256, %s345_s3, [#allocation4], %s251_s1, %s251_s1, %s252_s8  }
 0x101   :  { %247 = dma.done.wait [#allocation4], 256  }
 0x102   :  { %248 = vsyncadd [#allocation4], 4294967040 }
 0x103   :  { %136 = vsyncpa [#allocation3], 1 }
 0x104   :  { %137 = vsyncpa [#allocation6], 1 }
 0x105   :  { %138 = vsyncpa [#allocation4], 1 }

</bundles_post_ra>
